<compile_context>
chip_gen: v6e
topology: v6e:2x2x1
jax: 0.10.0
libtpu: 0.0.40
codegen_flags: <defaults>
</compile_context>

<pallas_src>
import functools

import jax
import jax.numpy as jnp
from jax import lax
from jax.experimental import pallas as pl
from jax.experimental.pallas import tpu as pltpu


def _round_up(x, m):
    return ((x + m - 1) // m) * m


def _pad_cols(a, n_cols):
    pad = n_cols - a.shape[1]
    if pad == 0:
        return a
    return jnp.pad(a, ((0, 0), (0, pad)))


def _pick_block_cols(n, c, block_cols=None, target_bytes=512 * 1024, max_cols=16384):
    """Lane-tile width: multiple of 128, ~target_bytes per (C, tn) f32 block."""
    n_pad128 = _round_up(max(n, 1), 128)
    if block_cols is not None:
        tn = _round_up(int(block_cols), 128)
    else:
        tn = (target_bytes // (4 * max(int(c), 1))) // 128 * 128
        tn = max(128, min(tn, max_cols))
    return int(min(tn, n_pad128))


def _focal_columns(x, labels, *, alpha, gamma, logits):
    """x: (C, tn) f32 (classes on sublanes, samples on lanes), labels: (1, tn) i32.

    Returns (1, tn) f32 per-sample focal loss.
    """
    cls = lax.broadcasted_iota(jnp.int32, x.shape, 0)               # class index per sublane
    picked = jnp.sum(jnp.where(cls == labels, x, 0.0), axis=0, keepdims=True)  # x[:, y]
    if logits:
        cmax = jnp.max(x, axis=0, keepdims=True)
        lse = cmax + jnp.log(jnp.sum(jnp.exp(x - cmax), axis=0, keepdims=True))
        ce = lse - picked                                           # cross-entropy
    else:
        ce = -picked                                                # nll on log-probs
    pt = jnp.exp(-ce)
    return alpha * (1.0 - pt) ** gamma * ce


def _kernel_no_reduce(x_ref, y_ref, out_ref, *, alpha, gamma, logits):
    x = x_ref[...].astype(jnp.float32)
    out_ref[...] = _focal_columns(x, y_ref[...], alpha=alpha, gamma=gamma, logits=logits)


def _kernel_reduce(x_ref, y_ref, out_ref, *, alpha, gamma, logits, tn,
                   tiles_per_core, n_valid):
    c = pl.program_id(0)       # "parallel" core-split axis
    i = pl.program_id(1)       # "arbitrary" reduction axis (last, fastest)

    @pl.when(i == 0)
    def _():
        out_ref[...] = jnp.zeros_like(out_ref)

    x = x_ref[...].astype(jnp.float32)
    loss = _focal_columns(x, y_ref[...], alpha=alpha, gamma=gamma, logits=logits)  # (1, tn)

    # Mask out padded columns (arbitrary N support).
    col = (c * tiles_per_core + i) * tn + lax.broadcasted_iota(jnp.int32, loss.shape, 1)
    loss = jnp.where(col < n_valid, loss, 0.0)

    # Vector accumulator resident in VMEM (output block index is constant along i).
    out_ref[...] += loss


def focal_loss(inputs, targets, *, alpha=1.0, gamma=2, logits=True, reduce=True,
               block_cols=None):
    """inputs: (N, C) float logits (or log-probs if logits=False), targets: (N,) ints."""
    N, C = inputs.shape
    tn = _pick_block_cols(N, C, block_cols)
    total_tiles = pl.cdiv(N, tn)

    xT = jnp.transpose(inputs)                       # (C, N): samples on lanes (done in XLA)
    y2 = targets.astype(jnp.int32).reshape(1, N)     # lane-dense labels

    if reduce:
        n_split = 2 if total_tiles >= 2 else 1       # feed both v7x TensorCores
        tiles_per_core = pl.cdiv(total_tiles, n_split)
        n_pad = n_split * tiles_per_core * tn
        xT = _pad_cols(xT, n_pad)
        y2 = _pad_cols(y2, n_pad)

        out = pl.pallas_call(
            functools.partial(
                _kernel_reduce, alpha=float(alpha), gamma=gamma, logits=logits,
                tn=tn, tiles_per_core=tiles_per_core, n_valid=N),
            out_shape=jax.ShapeDtypeStruct((1, n_split * tn), jnp.float32),
            grid_spec=pltpu.PrefetchScalarGridSpec(
                num_scalar_prefetch=0,
                grid=(n_split, tiles_per_core),
                in_specs=[
                    pl.BlockSpec((C, tn), lambda c, i: (0, c * tiles_per_core + i)),
                    pl.BlockSpec((1, tn), lambda c, i: (0, c * tiles_per_core + i)),
                ],
                out_specs=pl.BlockSpec((1, tn), lambda c, i: (0, c)),
            ),
            compiler_params=pltpu.CompilerParams(
                dimension_semantics=("parallel", "arbitrary")),
        )(xT, y2)
        # Final cross-lane reduction + mean done once in the wrapper (tiny XLA op).
        return jnp.sum(out) / jnp.float32(N)

    else:
        n_pad = total_tiles * tn
        xT = _pad_cols(xT, n_pad)
        y2 = _pad_cols(y2, n_pad)

        out = pl.pallas_call(
            functools.partial(_kernel_no_reduce, alpha=float(alpha), gamma=gamma,
                              logits=logits),
            out_shape=jax.ShapeDtypeStruct((1, n_pad), jnp.float32),
            grid_spec=pltpu.PrefetchScalarGridSpec(
                num_scalar_prefetch=0,
                grid=(total_tiles,),
                in_specs=[
                    pl.BlockSpec((C, tn), lambda i: (0, i)),
                    pl.BlockSpec((1, tn), lambda i: (0, i)),
                ],
                out_specs=pl.BlockSpec((1, tn), lambda i: (0, i)),   # lane-dense output slab
            ),
            compiler_params=pltpu.CompilerParams(
                dimension_semantics=("parallel",)),
        )(xT, y2)
        return out[0, :N]


def _reference(inputs, targets, alpha=1.0, gamma=2, logits=True, reduce=True):
    # Pure-JAX mirror of the PyTorch FocalLoss.forward.
    n = inputs.shape[0]
    logp = jax.nn.log_softmax(inputs, axis=1) if logits else inputs
    ce = -logp[jnp.arange(n), targets]
    pt = jnp.exp(-ce)
    fl = alpha * (1.0 - pt) ** gamma * ce
    return jnp.mean(fl) if reduce else fl


def _check(inputs, targets, **kw):
    out_mean = focal_loss(inputs, targets, reduce=True, **kw)
    out_vec = focal_loss(inputs, targets, reduce=False, **kw)
    out_mean, out_vec = jax.block_until_ready((out_mean, out_vec))
    kw.pop("block_cols", None)
    ref_mean = _reference(inputs, targets, reduce=True, **kw)
    ref_vec = _reference(inputs, targets, reduce=False, **kw)
    assert jnp.allclose(out_mean, ref_mean, atol=1e-5, rtol=1e-5), (out_mean, ref_mean)
    assert jnp.allclose(out_vec, ref_vec, atol=1e-5, rtol=1e-5)


if __name__ == "__main__":
    key = jax.random.PRNGKey(0)
    k1, k2, k3, k4 = jax.random.split(key, 4)

    # Case 1: N not a multiple of 128 (exercises padding/masking), single tile.
    N, C = 100, 10
    raw_logits = jax.random.normal(k1, (N, C), dtype=jnp.float32)
    targets = jax.random.randint(k2, (N,), 0, C, dtype=jnp.int32)
    _check(raw_logits, targets, alpha=1.0, gamma=2, logits=True)

    # Case 1b: logits=False (nll path: inputs are log-probabilities).
    _check(jax.nn.log_softmax(raw_logits, axis=1), targets,
           alpha=1.0, gamma=2, logits=False)

    # Case 2: multi-tile grid + two-way core split + odd tile count + non-default alpha.
    N2, C2 = 300, 12
    logits2 = jax.random.normal(k3, (N2, C2), dtype=jnp.float32)
    targets2 = jax.random.randint(k4, (N2,), 0, C2, dtype=jnp.int32)
    _check(logits2, targets2, alpha=0.25, gamma=2, logits=True, block_cols=128)

    print("KERNEL_OK")
</pallas_src>

<mosaic_0001>
module attributes {stable_mosaic.version = 11 : i64} {
  func.func @_kernel_reduce(%arg0: i32, %arg1: i32, %arg2: memref<10x128xf32, #tpu.memory_space<vmem>>, %arg3: memref<1x128xi32, #tpu.memory_space<vmem>>, %arg4: memref<1x128xf32, #tpu.memory_space<vmem>>) attributes {dimension_semantics = [#tpu.dimension_semantics<parallel>, #tpu.dimension_semantics<arbitrary>], iteration_bounds = array<i64: 1, 1>, scalar_prefetch = 0 : i64, scratch_operands = 0 : i64, tpu.core_type = #tpu.core_type<tc>, window_params = [{transform_indices = @transform_0, window_bounds = array<i64: 10, 128>}, {transform_indices = @transform_1, window_bounds = array<i64: 1, 128>}, {transform_indices = @transform_2, window_bounds = array<i64: 1, 128>}]} {
    %c0_i32 = arith.constant 0 : i32
    %0 = arith.cmpi eq, %arg1, %c0_i32 : i32
    %1 = arith.extui %0 : i1 to i32
    %c0_i32_0 = arith.constant 0 : i32
    %2 = arith.cmpi ne, %1, %c0_i32_0 : i32
    scf.if %2 {
      %cst_15 = arith.constant 0.000000e+00 : f32
      %44 = vector.broadcast %cst_15 : f32 to vector<1x128xf32>
      %c0_16 = arith.constant 0 : index
      %c0_17 = arith.constant 0 : index
      %45 = vector.load %arg4[%c0_16, %c0_17] : memref<1x128xf32, #tpu.memory_space<vmem>>, vector<1x128xf32>
      tpu.vector_store %arg4[%c0_16, %c0_17], %44 {strides = array<i32>} : memref<1x128xf32, #tpu.memory_space<vmem>>, vector<1x128xf32>,
    } else {
    }
    %c0 = arith.constant 0 : index
    %c0_1 = arith.constant 0 : index
    %3 = vector.load %arg2[%c0, %c0_1] : memref<10x128xf32, #tpu.memory_space<vmem>>, vector<10x128xf32>
    %c0_2 = arith.constant 0 : index
    %c0_3 = arith.constant 0 : index
    %4 = vector.load %arg3[%c0_2, %c0_3] : memref<1x128xi32, #tpu.memory_space<vmem>>, vector<1x128xi32>
    %5 = tpu.iota {dimensions = array<i32: 0>} : vector<10x128xi32>
    %6 = vector.broadcast %4 : vector<1x128xi32> to vector<10x128xi32>
    %7 = arith.cmpi eq, %5, %6 : vector<10x128xi32>
    %cst = arith.constant 0.000000e+00 : f32
    %8 = vector.broadcast %cst : f32 to vector<10x128xf32>
    %9 = arith.select %7, %3, %8 : vector<10x128xi1>, vector<10x128xf32>
    %cst_4 = arith.constant dense<0.000000e+00> : vector<128xf32>
    %10 = vector.multi_reduction <add>, %9, %cst_4 [0] : vector<10x128xf32> to vector<128xf32>
    %11 = vector.shape_cast %10 : vector<128xf32> to vector<1x128xf32>
    %cst_5 = arith.constant dense<0xFF800000> : vector<128xf32>
    %12 = vector.multi_reduction <maximumf>, %3, %cst_5 [0] : vector<10x128xf32> to vector<128xf32>
    %13 = vector.shape_cast %12 : vector<128xf32> to vector<1x128xf32>
    %14 = vector.broadcast %13 : vector<1x128xf32> to vector<10x128xf32>
    %15 = arith.subf %3, %14 : vector<10x128xf32>
    %16 = math.exp %15 : vector<10x128xf32>
    %cst_6 = arith.constant dense<0.000000e+00> : vector<128xf32>
    %17 = vector.multi_reduction <add>, %16, %cst_6 [0] : vector<10x128xf32> to vector<128xf32>
    %18 = vector.shape_cast %17 : vector<128xf32> to vector<1x128xf32>
    %19 = math.log %18 : vector<1x128xf32>
    %20 = arith.addf %13, %19 : vector<1x128xf32>
    %21 = arith.subf %20, %11 : vector<1x128xf32>
    %cst_7 = arith.constant 0.000000e+00 : f32
    %22 = vector.broadcast %cst_7 : f32 to vector<1x128xf32>
    %23 = arith.subf %22, %21 : vector<1x128xf32>
    %24 = math.exp %23 : vector<1x128xf32>
    %cst_8 = arith.constant 1.000000e+00 : f32
    %25 = vector.broadcast %cst_8 : f32 to vector<1x128xf32>
    %26 = arith.subf %25, %24 : vector<1x128xf32>
    %27 = arith.mulf %26, %26 : vector<1x128xf32>
    %cst_9 = arith.constant 1.000000e+00 : f32
    %28 = vector.broadcast %cst_9 : f32 to vector<1x128xf32>
    %29 = arith.mulf %28, %27 : vector<1x128xf32>
    %30 = arith.mulf %29, %21 : vector<1x128xf32>
    %c1_i32 = arith.constant 1 : i32
    %31 = arith.muli %arg0, %c1_i32 : i32
    %32 = arith.addi %31, %arg1 : i32
    %c128_i32 = arith.constant 128 : i32
    %33 = arith.muli %32, %c128_i32 : i32
    %34 = tpu.iota {dimensions = array<i32: 1>} : vector<1x128xi32>
    %35 = vector.broadcast %33 : i32 to vector<1x128xi32>
    %36 = arith.addi %35, %34 : vector<1x128xi32>
    %c100_i32 = arith.constant 100 : i32
    %37 = vector.broadcast %c100_i32 : i32 to vector<1x128xi32>
    %38 = arith.cmpi slt, %36, %37 : vector<1x128xi32>
    %cst_10 = arith.constant 0.000000e+00 : f32
    %39 = vector.broadcast %cst_10 : f32 to vector<1x128xf32>
    %40 = arith.select %38, %30, %39 : vector<1x128xi1>, vector<1x128xf32>
    %c0_11 = arith.constant 0 : index
    %c0_12 = arith.constant 0 : index
    %41 = vector.load %arg4[%c0_11, %c0_12] : memref<1x128xf32, #tpu.memory_space<vmem>>, vector<1x128xf32>
    %42 = arith.addf %41, %40 : vector<1x128xf32>
    %c0_13 = arith.constant 0 : index
    %c0_14 = arith.constant 0 : index
    %43 = vector.load %arg4[%c0_13, %c0_14] : memref<1x128xf32, #tpu.memory_space<vmem>>, vector<1x128xf32>
    tpu.vector_store %arg4[%c0_13, %c0_14], %42 {strides = array<i32>} : memref<1x128xf32, #tpu.memory_space<vmem>>, vector<1x128xf32>,
    return
  }
  func.func @transform_0(%arg0: i32, %arg1: i32) -> (i32, i32) {
    %c1_i32 = arith.constant 1 : i32
    %0 = arith.muli %arg0, %c1_i32 : i32
    %1 = arith.addi %0, %arg1 : i32
    %c0_i32 = arith.constant 0 : i32
    %c0_i32_0 = arith.constant 0 : i32
    return %c0_i32, %1 : i32, i32
  }
  func.func @transform_1(%arg0: i32, %arg1: i32) -> (i32, i32) {
    %c1_i32 = arith.constant 1 : i32
    %0 = arith.muli %arg0, %c1_i32 : i32
    %1 = arith.addi %0, %arg1 : i32
    %c0_i32 = arith.constant 0 : i32
    %c0_i32_0 = arith.constant 0 : i32
    return %c0_i32, %1 : i32, i32
  }
  func.func @transform_2(%arg0: i32, %arg1: i32) -> (i32, i32) {
    %c0_i32 = arith.constant 0 : i32
    %c0_i32_0 = arith.constant 0 : i32
    return %c0_i32, %arg0 : i32, i32
  }
}

</mosaic_0001>

<bundles_post_ra>
// kernel: tpu_custom_call.1
= control target key start
LH: loop header
LB: loop body
LE: loop exit
PB: predicated region body
PF: predicated region fallthrough
CT: control target
= control target key end

     0   :  { %7 = vsyncpa [#allocation3], 0  ;;  %s223_s0 = inlined_call_operand.hbm [shape: f32[10,128], index: 0, kind: input, shape index: {}]   ;;  %s224_s1 = inlined_call_operand.vmem [shape: s32[1,128], index: 1, kind: input, shape index: {}]   ;;  %s225_s2 = inlined_call_operand.hbm [shape: f32[1,128], index: 2, kind: output, shape index: {}]  }
   0x1   :  { %8 = vsyncpa [#allocation4], 0  ;;  %s191_s9 = smov [#allocation2]  }
   0x2   :  { %s17_s10 = sshll.u32 %s191_s9, 4  ;;  %s18_s10 = int_to_ptr.vmem [resolvable:$true] %s17_s10 }
   0x3   :  { %s155_s11 = scalar_lea.vmem %s18_s10, 256  ;;  %p160_p1 = scmp.lt.s32.totalorder %s18_s10, %s18_s10 }
   0x4   :  { %p156_p0 = scmp.ne.s32.totalorder %s18_s10, %s155_s11  ;;  %p161_p2 = scmp.lt.s32.totalorder %s155_s11, %s155_s11 }
   0x6   :  { %p162_p3 = por %p161_p2, %p160_p1 }
   0x8   :  { %p163_p4 = pnand %p162_p3, %p156_p0 }
   0xa   :  { %166 = shalt.err (!%p163_p4)
}
   0xb   :  { %s192_s12 = smov 128   ;;  %s193_s13 = smov 8  }
   0xc   :  { %23 = dma.hbm_to_vmem [thread:$0]  %s223_s0, 256, %s18_s10, [#allocation3], %s192_s12, %s192_s12, %s193_s13  }
   0xd   :  { %187 = dma.done.wait [#allocation3], 256  }
   0xe   :  { %188 = vsyncadd [#allocation3], 4294967040  ;;  %v194_v0 = vmov 0.0   ;;  %vm63_vm0 = vcmask 1041408   ;;  %v49_v1 = vld [vmem:[#allocation2] sm:$0xff]  ;;  %v52_v15 = vlaneseq }
   0xf   :  { %48 = vst [vmem:[#allocation5] sm:$0x1] %v194_v0  ;;  %v50_v2 = vld [vmem:[#allocation2 + $0x8] sm:$0x3]  ;;  %v133_v18 = vld [vmem:[%s224_s1] ss:$0 sm:$0xff] }
  0x10   :  { %v72_v3 = vsel %vm63_vm0, %v50_v2, -inf  ;;  %v53_v16 = vshrl.u32 %v52_v15, 7  ;;  %v107_v46 = vand.u32 127, %v52_v15  ;;  %s195_s1 = smov [#allocation5]  }
  0x11   :  { %v73_v4 = vmax.f32 %v49_v1, %v72_v3  ;;  %s121_s17 = sshll.u32 %s195_s1, 4  ;;  %s122_s17 = int_to_ptr.vmem [resolvable:$true] %s121_s17 }
  0x12   :  { %v54_v17 = vadd.s32 8, %v53_v16  ;;  %vm59_vm2 = vcmp.eq.s32.totalorder %v53_v16, %v133_v18  ;;  %vm110_vm3 = vcmp.lt.s32.totalorder %v107_v46, 100  ;;  %s167_s18 = scalar_lea.vmem %s122_s17, 16  ;;  %s171_s19 = scalar_lea.vmem %s122_s17, 32 }
  0x13   :  { %v74_v5 = vrot.slane %v73_v4, 4  ;;  %v61_v24 = vsel %vm59_vm2, %v49_v1, 0.0  ;;  %p168_p5 = scmp.ne.s32.totalorder %s122_s17, %s167_s18  ;;  %p172_p6 = scmp.lt.s32.totalorder %s122_s17, %s122_s17 }
  0x14   :  { %vm60_vm1 = vcmp.eq.s32.totalorder %v54_v17, %v133_v18  ;;  %p173_p7 = scmp.lt.s32.totalorder %s171_s19, %s167_s18 }
  0x15   :  { %v75_v6 = vmax.f32 %v73_v4, %v74_v5  ;;  %v62_v21 = vsel %vm60_vm1, %v50_v2, 0.0 }
  0x16   :  { %v64_v25 = vsel %vm63_vm0, %v62_v21, 0.0  ;;  %v112_v50 = vld [vmem:[#allocation5] sm:$0x1]  ;;  %p174_p8 = por %p173_p7, %p172_p6 }
  0x17   :  { %v76_v7 = vrot.slane %v75_v6, 2  ;;  %v65_v27 = vadd.f32 %v64_v25, %v61_v24 }
  0x18   :  { %p175_p9 = pnand %p174_p8, %p168_p5 }
  0x19   :  { %v77_v8 = vmax.f32 %v75_v6, %v76_v7  ;;  %v66_v30 = vrot.slane %v65_v27, 4 }
  0x1b   :  { %v78_v9 = vrot.slane %v77_v8, 1  ;;  %v67_v33 = vadd.f32 %v66_v30, %v65_v27 }
  0x1d   :  { %v79_v10 = vmax.f32 %v77_v8, %v78_v9  ;;  %v68_v35 = vrot.slane %v67_v33, 2 }
  0x1f   :  { %v80_v11 = vsub.f32 %v49_v1, %v79_v10  ;;  %v81_v12 = vsub.f32 %v50_v2, %v79_v10  ;;  %v69_v36 = vadd.f32 %v68_v35, %v67_v33 }
  0x21   :  { %v82_v13 = vmul.f32 1.442695, %v80_v11  ;;  %v84_v14 = vmul.f32 1.442695, %v81_v12  ;;  %v70_v37 = vrot.slane %v69_v36, 1 }
  0x23   :  { %139 = vpow2.f32 %v82_v13  ;;  %v71_v39 = vadd.f32 %v70_v37, %v69_v36 }
  0x24   :  { %141 = vpow2.f32 %v84_v14 }
  0x30   :  { %v140_v19 = vpop.eup %139 }
  0x31   :  { %v142_v20 = vpop.eup %141 }
  0x32   :  { %v86_v22 = vsel %vm63_vm0, %v142_v20, 0.0 }
  0x33   :  { %v87_v23 = vadd.f32 %v140_v19, %v86_v22 }
  0x35   :  { %v88_v26 = vrot.slane %v87_v23, 4 }
  0x37   :  { %v89_v28 = vadd.f32 %v88_v26, %v87_v23 }
  0x39   :  { %v90_v29 = vrot.slane %v89_v28, 2 }
  0x3b   :  { %v91_v31 = vadd.f32 %v90_v29, %v89_v28 }
  0x3d   :  { %v92_v32 = vrot.slane %v91_v31, 1 }
  0x3f   :  { %v93_v34 = vadd.f32 %v92_v32, %v91_v31 }
  0x41   :  { %143 = vlog2.f32 %v93_v34 }
  0x4e   :  { %v144_v38 = vpop.eup %143 }
  0x4f   :  { %v95_v40 = vmul.f32 0.6931472, %v144_v38 }
  0x51   :  { %v96_v41 = vadd.f32 %v95_v40, %v79_v10 }
  0x53   :  { %v97_v42 = vsub.f32 %v96_v41, %v71_v39 }
  0x55   :  { %v98_v43 = vsub.f32 0.0, %v97_v42 }
  0x57   :  { %v99_v44 = vmul.f32 1.442695, %v98_v43 }
  0x59   :  { %145 = vpow2.f32 %v99_v44 }
  0x66   :  { %v146_v45 = vpop.eup %145 }
  0x67   :  { %v101_v47 = vsub.f32 1.0, %v146_v45 }
  0x69   :  { %v102_v48 = vmul.f32 %v101_v47, %v101_v47 }
  0x6b   :  { %v103_v49 = vmul.f32 %v102_v48, %v97_v42 }
  0x6d   :  { %v111_v51 = vsel %vm110_vm3, %v103_v49, 0.0 }
  0x6e   :  { %v113_v52 = vadd.f32 %v112_v50, %v111_v51 }
  0x70   :  { %114 = vst [vmem:[#allocation5] sm:$0x1] %v113_v52 }
  0x71   :  { %178 = shalt.err (!%p175_p9)
}
  0x72   :  { %124 = dma.vmem_to_hbm [thread:$0]  %s122_s17, 16, %s225_s2, [#allocation4]  }
  0x73   :  { %189 = dma.done.wait [#allocation4], 16  }
  0x74   :  { %190 = vsyncadd [#allocation4], 4294967280 }
  0x75   :  { %128 = vsyncpa [#allocation3], 1 }
  0x76   :  { %129 = vsyncpa [#allocation4], 1 }

</bundles_post_ra>
